<compile_context>
chip_gen: v7x
topology: tpu7x:2x2x1
jax: 0.10.0
libtpu: 0.0.40
codegen_flags: <defaults>
</compile_context>

<pallas_src>
import math

import jax
import jax.numpy as jnp
from jax.experimental import pallas as pl
from jax.experimental.pallas import tpu as pltpu

# Module hyperparameters (IF.__init__ defaults and module-level constants).
V_THRESHOLD = 1.0
V_RESET = 0.0
ALPHA = 1.0            # only used by the surrogate backward; unused in forward
GAMMA = 0.2
THRESH_DECAY = 0.7

_LANE_CHOICES = (2048, 1024, 512, 256, 128)   # lane axis is always k * 128
_PAD_LANES = 512                              # fallback lane width (pads flat tail)
_TARGET_TILE_BYTES = 2 << 20                  # ~2 MiB per array per block
_MIN_GRID_STEPS = 4                           # keep pipelining / megacore busy
_VMEM_LIMIT_BYTES = 48 << 20                  # safe on v5e/v6e (128 MiB) & v7x (64 MiB)


def _if_kernel(dv_ref, v_ref, vth_ref, spike_ref, v_out_ref, vth_out_ref):
    # v += dv
    v = v_ref[...] + dv_ref[...]
    # trianglespike forward == hard step: (v - thresh > 0)  <=>  (v > thresh)
    fired = v > V_THRESHOLD
    spike = fired.astype(jnp.float32)
    spike_ref[...] = spike
    # hard reset: (1 - spike) * v + spike * v_reset  ==  where(fired, v_reset, v)
    v_out_ref[...] = jnp.where(fired, jnp.float32(V_RESET), v)
    # adaptive threshold: v_th = gamma * spike + v_th * thresh_decay
    vth_out_ref[...] = GAMMA * spike + THRESH_DECAY * vth_ref[...]


def _pick_layout(total):
    """Choose (lanes, rows, pad) with lanes a multiple of 128 (lane-dense)."""
    # Prefer the widest lane count that divides `total` and still gives >= 8 rows.
    for lanes in _LANE_CHOICES:
        if total % lanes == 0 and total // lanes >= 8:
            return lanes, total // lanes, 0
    # Otherwise any dividing lane width (tiny tensors).
    for lanes in _LANE_CHOICES:
        if total % lanes == 0:
            return lanes, total // lanes, 0
    # Nothing divides: pad the flat tail up to a multiple of _PAD_LANES.
    pad = (-total) % _PAD_LANES
    return _PAD_LANES, (total + pad) // _PAD_LANES, pad


def _pick_block_rows(rows, lanes):
    """Row-block (multiple of 8) targeting ~2 MiB tiles and >= _MIN_GRID_STEPS."""
    row_bytes = lanes * 4
    cap = max(8, (_TARGET_TILE_BYTES // row_bytes) // 8 * 8)
    if rows >= _MIN_GRID_STEPS * 8:
        # Shrink the block so the grid has at least _MIN_GRID_STEPS steps
        # (pipelining overlap; v7x megacore needs >= 2 steps to shard).
        cap = min(cap, max(8, (rows // _MIN_GRID_STEPS) // 8 * 8))
    if rows <= cap:
        return rows            # tiny tensor: one full-extent block (always legal)
    return cap


def if_forward(dv, v, v_th):
    """One IF neuron step.

    Args:
      dv   : float32 input current (any shape).
      v    : float32 membrane potential state (same shape).
      v_th : float32 adaptive threshold state (same shape).

    Returns:
      (spike, v_new, v_th_new), each the same shape/dtype as the inputs.
    """
    orig_shape = dv.shape
    total = math.prod(orig_shape)
    lanes, rows, pad = _pick_layout(total)

    def to2d(x):
        flat = x.reshape(-1)
        if pad:
            flat = jnp.pad(flat, (0, pad))
        return flat.reshape(rows, lanes)

    dv2, v2, vth2 = to2d(dv), to2d(v), to2d(v_th)

    block_rows = _pick_block_rows(rows, lanes)
    grid = (pl.cdiv(rows, block_rows),)          # partial last block is fine

    spec = pl.BlockSpec((block_rows, lanes), lambda i: (i, 0))
    out_sds = jax.ShapeDtypeStruct((rows, lanes), jnp.float32)

    spike2, v_new2, vth_new2 = pl.pallas_call(
        _if_kernel,
        out_shape=(out_sds, out_sds, out_sds),
        grid=grid,
        in_specs=[spec, spec, spec],
        out_specs=(spec, spec, spec),
        # v and v_th are state updates: reuse their buffers in place.
        input_output_aliases={1: 1, 2: 2},
        compiler_params=pltpu.CompilerParams(
            dimension_semantics=("parallel",),
            vmem_limit_bytes=_VMEM_LIMIT_BYTES),
    )(dv2, v2, vth2)

    def from2d(x):
        flat = x.reshape(-1)
        if pad:
            flat = flat[:total]
        return flat.reshape(orig_shape)

    return from2d(spike2), from2d(v_new2), from2d(vth_new2)


def _reference(dv, v, v_th):
    v = v + dv
    spike = (v > V_THRESHOLD).astype(jnp.float32)
    v_new = (1.0 - spike) * v + spike * V_RESET
    vth_new = GAMMA * spike + v_th * THRESH_DECAY
    return spike, v_new, vth_new


if __name__ == "__main__":
    key = jax.random.PRNGKey(0)
    N, C, H, W = 2, 4, 16, 16
    dv = jax.random.normal(key, (N, C, H, W), dtype=jnp.float32) * 2.0

    # IF.reset(): v = 0.0, v_th = v_threshold (broadcast to tensor state here).
    v0 = jnp.zeros((N, C, H, W), dtype=jnp.float32)
    vth0 = jnp.full((N, C, H, W), V_THRESHOLD, dtype=jnp.float32)

    # Compute the reference BEFORE the kernel call: v0/vth0 are donated below.
    ref_spike, ref_v, ref_vth = _reference(dv, v0, vth0)
    jax.block_until_ready((ref_spike, ref_v, ref_vth))

    step = jax.jit(if_forward, donate_argnums=(1, 2))
    spike, v_new, vth_new = step(dv, v0, vth0)
    jax.block_until_ready((spike, v_new, vth_new))

    assert jnp.allclose(spike, ref_spike), "spike mismatch"
    assert jnp.allclose(v_new, ref_v, atol=1e-6), "v mismatch"
    assert jnp.allclose(vth_new, ref_vth, atol=1e-6), "v_th mismatch"

    print("KERNEL_OK")
</pallas_src>

<mosaic_0001>
module attributes {stable_mosaic.version = 11 : i64} {
  func.func @_if_kernel(%arg0: i32, %arg1: memref<8x256xf32, #tpu.memory_space<vmem>>, %arg2: memref<8x256xf32, #tpu.memory_space<vmem>>, %arg3: memref<8x256xf32, #tpu.memory_space<vmem>>, %arg4: memref<8x256xf32, #tpu.memory_space<vmem>>, %arg5: memref<8x256xf32, #tpu.memory_space<vmem>>, %arg6: memref<8x256xf32, #tpu.memory_space<vmem>>) attributes {dimension_semantics = [#tpu.dimension_semantics<parallel>], iteration_bounds = array<i64: 1>, scalar_prefetch = 0 : i64, scratch_operands = 0 : i64, tpu.core_type = #tpu.core_type<tc>, window_params = [{transform_indices = @transform_0, window_bounds = array<i64: 8, 256>}, {transform_indices = @transform_1, window_bounds = array<i64: 8, 256>}, {transform_indices = @transform_2, window_bounds = array<i64: 8, 256>}, {transform_indices = @transform_3, window_bounds = array<i64: 8, 256>}, {transform_indices = @transform_4, window_bounds = array<i64: 8, 256>}, {transform_indices = @transform_5, window_bounds = array<i64: 8, 256>}]} {
    %c0 = arith.constant 0 : index
    %c0_0 = arith.constant 0 : index
    %0 = vector.load %arg2[%c0, %c0_0] : memref<8x256xf32, #tpu.memory_space<vmem>>, vector<8x256xf32>
    %c0_1 = arith.constant 0 : index
    %c0_2 = arith.constant 0 : index
    %1 = vector.load %arg1[%c0_1, %c0_2] : memref<8x256xf32, #tpu.memory_space<vmem>>, vector<8x256xf32>
    %2 = arith.addf %0, %1 : vector<8x256xf32>
    %cst = arith.constant 1.000000e+00 : f32
    %3 = vector.broadcast %cst : f32 to vector<8x256xf32>
    %4 = arith.cmpf ogt, %2, %3 : vector<8x256xf32>
    %5 = arith.extui %4 : vector<8x256xi1> to vector<8x256xi32>
    %6 = arith.sitofp %5 : vector<8x256xi32> to vector<8x256xf32>
    %c0_3 = arith.constant 0 : index
    %c0_4 = arith.constant 0 : index
    %7 = vector.load %arg4[%c0_3, %c0_4] : memref<8x256xf32, #tpu.memory_space<vmem>>, vector<8x256xf32>
    tpu.vector_store %arg4[%c0_3, %c0_4], %6 {strides = array<i32>} : memref<8x256xf32, #tpu.memory_space<vmem>>, vector<8x256xf32>,
    %cst_5 = arith.constant 0.000000e+00 : f32
    %8 = vector.broadcast %cst_5 : f32 to vector<8x256xf32>
    %9 = arith.select %4, %8, %2 : vector<8x256xi1>, vector<8x256xf32>
    %c0_6 = arith.constant 0 : index
    %c0_7 = arith.constant 0 : index
    %10 = vector.load %arg5[%c0_6, %c0_7] : memref<8x256xf32, #tpu.memory_space<vmem>>, vector<8x256xf32>
    tpu.vector_store %arg5[%c0_6, %c0_7], %9 {strides = array<i32>} : memref<8x256xf32, #tpu.memory_space<vmem>>, vector<8x256xf32>,
    %cst_8 = arith.constant 2.000000e-01 : f32
    %11 = vector.broadcast %cst_8 : f32 to vector<8x256xf32>
    %12 = arith.mulf %11, %6 : vector<8x256xf32>
    %c0_9 = arith.constant 0 : index
    %c0_10 = arith.constant 0 : index
    %13 = vector.load %arg3[%c0_9, %c0_10] : memref<8x256xf32, #tpu.memory_space<vmem>>, vector<8x256xf32>
    %cst_11 = arith.constant 0.699999988 : f32
    %14 = vector.broadcast %cst_11 : f32 to vector<8x256xf32>
    %15 = arith.mulf %14, %13 : vector<8x256xf32>
    %16 = arith.addf %12, %15 : vector<8x256xf32>
    %c0_12 = arith.constant 0 : index
    %c0_13 = arith.constant 0 : index
    %17 = vector.load %arg6[%c0_12, %c0_13] : memref<8x256xf32, #tpu.memory_space<vmem>>, vector<8x256xf32>
    tpu.vector_store %arg6[%c0_12, %c0_13], %16 {strides = array<i32>} : memref<8x256xf32, #tpu.memory_space<vmem>>, vector<8x256xf32>,
    return
  }
  func.func @transform_0(%arg0: i32) -> (i32, i32) {
    %c0_i32 = arith.constant 0 : i32
    %c0_i32_0 = arith.constant 0 : i32
    return %arg0, %c0_i32 : i32, i32
  }
  func.func @transform_1(%arg0: i32) -> (i32, i32) {
    %c0_i32 = arith.constant 0 : i32
    %c0_i32_0 = arith.constant 0 : i32
    return %arg0, %c0_i32 : i32, i32
  }
  func.func @transform_2(%arg0: i32) -> (i32, i32) {
    %c0_i32 = arith.constant 0 : i32
    %c0_i32_0 = arith.constant 0 : i32
    return %arg0, %c0_i32 : i32, i32
  }
  func.func @transform_3(%arg0: i32) -> (i32, i32) {
    %c0_i32 = arith.constant 0 : i32
    %c0_i32_0 = arith.constant 0 : i32
    return %arg0, %c0_i32 : i32, i32
  }
  func.func @transform_4(%arg0: i32) -> (i32, i32) {
    %c0_i32 = arith.constant 0 : i32
    %c0_i32_0 = arith.constant 0 : i32
    return %arg0, %c0_i32 : i32, i32
  }
  func.func @transform_5(%arg0: i32) -> (i32, i32) {
    %c0_i32 = arith.constant 0 : i32
    %c0_i32_0 = arith.constant 0 : i32
    return %arg0, %c0_i32 : i32, i32
  }
}

</mosaic_0001>

<bundles_post_ra>
// kernel: if_forward.1
= control target key start
LH: loop header
LB: loop body
LE: loop exit
PB: predicated region body
PF: predicated region fallthrough
CT: control target
= control target key end

     0   :  { %v60_v9 = vmov 0.0   ;;  %s127_s0 = inlined_call_operand.vmem [shape: f32[8,256], index: 0, kind: input, shape index: {}]   ;;  %s128_s1 = inlined_call_operand.vmem [shape: f32[8,256], index: 1, kind: input, shape index: {}, may-alias: {1,4}]   ;;  %s129_s2 = inlined_call_operand.vmem [shape: f32[8,256], index: 2, kind: input, shape index: {}, may-alias: {2,5}]   ;;  %s130_s3 = inlined_call_operand.vmem [shape: f32[8,256], index: 3, kind: output, shape index: {0}]   ;;  %s131_s4 = inlined_call_operand.vmem [shape: f32[8,256], index: 4, kind: output, shape index: {1}, may-alias: {1,4}]   ;;  %s132_s5 = inlined_call_operand.vmem [shape: f32[8,256], index: 5, kind: output, shape index: {2}, may-alias: {2,5}]  }
   0x1   :  { %v17_v0 = vld [vmem:[%s128_s1] sm:$0xff]  ;;  %v18_v2 = vld [vmem:[%s128_s1 + $0x8] sm:$0xff] }
   0x2   :  { %v19_v1 = vld [vmem:[%s127_s0] sm:$0xff]  ;;  %v20_v4 = vld [vmem:[%s127_s0 + $0x8] sm:$0xff] }
   0x3   :  { %v21_v3 = vadd.f32 %v19_v1, %v17_v0  ;;  %v37_v5 = vld [vmem:[%s129_s2] sm:$0xff]  ;;  %v38_v6 = vld [vmem:[%s129_s2 + $0x8] sm:$0xff]  ;;  %v22_v7 = vadd.f32 %v20_v4, %v18_v2 }
   0x4   :  { %v39_v8 = vmul.f32 0.7, %v37_v5  ;;  %v40_v12 = vmul.f32 0.7, %v38_v6 }
   0x5   :  { %vm23_vm0 = vcmp.gt.f32.partialorder %v21_v3, 1.0  ;;  %vm24_vm1 = vcmp.gt.f32.partialorder %v22_v7, 1.0 }
   0x6   :  { %v57_v10 = vsel %vm23_vm0, 1.0, %v60_v9  ;;  %v31_v11 = vsel %vm23_vm0, 0.0, %v21_v3  ;;  %v58_v14 = vsel %vm24_vm1, 1.0, %v60_v9  ;;  %v32_v15 = vsel %vm24_vm1, 0.0, %v22_v7 }
   0x7   :  { %29 = vst [vmem:[%s130_s3] sm:$0xff] %v57_v10  ;;  %v35_v13 = vmul.f32 0.2, %v57_v10  ;;  %33 = vst [vmem:[%s131_s4] sm:$0xff] %v31_v11  ;;  %v36_v16 = vmul.f32 0.2, %v58_v14 }
   0x8   :  { %30 = vst [vmem:[%s130_s3 + $0x8] sm:$0xff] %v58_v14  ;;  %34 = vst [vmem:[%s131_s4 + $0x8] sm:$0xff] %v32_v15 }
   0x9   :  { %v41_v17 = vadd.f32 %v39_v8, %v35_v13  ;;  %v42_v18 = vadd.f32 %v40_v12, %v36_v16 }
   0xb   :  { %43 = vst [vmem:[%s132_s5] sm:$0xff] %v41_v17  ;;  %44 = vst [vmem:[%s132_s5 + $0x8] sm:$0xff] %v42_v18 }

</bundles_post_ra>
